<compile_context>
chip_gen: v7x
topology: tpu7x:2x2x1
jax: 0.10.0
libtpu: 0.0.40
codegen_flags: <defaults>
</compile_context>

<pallas_src>
import math

import jax
import jax.numpy as jnp
from jax.experimental import pallas as pl
from jax.experimental.pallas import tpu as pltpu


def _round_up(x, m):
    return ((x + m - 1) // m) * m


def _vmem_capacity_bytes():
    """Per-core VMEM capacity; conservative 64 MiB fallback (v7x per-TC) if unknown."""
    try:
        info = pltpu.get_tpu_info()
        cap = getattr(info, "vmem_capacity_bytes", None)
        if cap:
            return int(cap)
    except Exception:
        pass
    return 64 * 2 ** 20


def _pick_vocab_tile(vocab_pad, target):
    """Largest tile (multiple of 256, else 128) dividing vocab_pad and <= target."""
    target = max(128, target)
    for grain in (256, 128):          # prefer 256-wide tiles (MXU is 256x256 on v6e/v7x)
        if vocab_pad % grain != 0 or target < grain:
            continue
        tn = min(target - target % grain, vocab_pad)
        while vocab_pad % tn != 0:
            tn -= grain
        return tn
    return vocab_pad  # unreachable: vocab_pad is always a multiple of 128


def _derive_tiles(M, d_model, vocab_pad, x_itemsize, out_itemsize,
                  tile_m, tile_n, vmem_cap):
    """Pick (tm, tn) so double-buffered tiles + the resident output fit VMEM."""
    budget = int(0.70 * vmem_cap)
    if tile_m is None:
        # 512-row tiles on 128 MiB parts (v5e/v6e); 256 on 64 MiB/TC parts (v7x).
        tile_m = 512 if vmem_cap >= 96 * 2 ** 20 else 256
    if tile_n is None:
        tile_n = 1024

    # Vocab tile: double-buffered bf16 weight tiles capped at ~35% of the budget.
    tn_cap = (budget * 35 // 100) // max(1, 2 * d_model * 2)
    tn = _pick_vocab_tile(vocab_pad, min(tile_n, max(128, tn_cap)))

    # Row tile: resident output block + x tiles + scratch fill the remainder.
    w_bytes = 2 * d_model * tn * 2 + 2 * 8 * tn * 4          # weight + bias buffers
    per_row = (2 * vocab_pad * out_itemsize                  # resident output (x2 bufs)
               + 2 * d_model * x_itemsize                    # x tiles (x2 bufs)
               + 2 * 128 * 4)                                # (tm,1) f32 lse scratches
    tm_cap = max(8, ((budget - w_bytes) // per_row) // 8 * 8)
    tm = max(8, min(tile_m, tm_cap) // 8 * 8)
    tm = min(tm, _round_up(M, 8))

    # Megacore (v7x has 2 TCs): keep at least two row tiles when there is enough work.
    if M > 8 and pl.cdiv(M, tm) < 2:
        tm = _round_up(pl.cdiv(M, 2), 8)
    return tm, tn


def _generator_kernel(x_ref, w_ref, b_ref, o_ref, m_sc, l_sc):
    # x_ref: (TM, d_model)           w_ref: (d_model, TN) bf16
    # b_ref: (1, TN) f32             o_ref: (TM, vocab_pad)  (resident across vocab axis)
    # m_sc, l_sc: (TM, 1) f32 running max / running sum-exp
    j = pl.program_id(1)
    tn = w_ref.shape[1]

    @pl.when(j == 0)
    def _init():
        m_sc[...] = jnp.full_like(m_sc, -jnp.inf)
        l_sc[...] = jnp.zeros_like(l_sc)

    # Linear: bf16 x bf16 on the MXU, f32 accumulation; bias added in f32.
    # Cast x in-kernel (free VPU work) instead of a wrapper-side HBM cast pass.
    x = x_ref[...].astype(jnp.bfloat16)
    logits = jnp.dot(x, w_ref[...], preferred_element_type=jnp.float32)
    logits = logits + b_ref[...]

    # Online logsumexp update (all f32; exp/log go to the EUP slot).
    m_prev = m_sc[...]
    m_new = jnp.maximum(m_prev, jnp.max(logits, axis=-1, keepdims=True))
    l_sc[...] = l_sc[...] * jnp.exp(m_prev - m_new) + jnp.sum(
        jnp.exp(logits - m_new), axis=-1, keepdims=True)
    m_sc[...] = m_new

    # Stash raw logits into the resident output row-block (lane-aligned slice).
    col0 = pl.multiple_of(j * tn, tn)
    o_ref[:, pl.ds(col0, tn)] = logits.astype(o_ref.dtype)

    # Last vocab tile: normalize the whole row-block with the finished logsumexp.
    # TODO(synk): emit lse as a small (M,1) side output and fuse the subtraction into
    # the downstream loss to drop this full-block read-modify-write epilogue.
    @pl.when(j == pl.num_programs(1) - 1)
    def _finalize():
        lse = m_sc[...] + jnp.log(l_sc[...])
        o_ref[...] = (o_ref[...].astype(jnp.float32) - lse).astype(o_ref.dtype)


def generator_forward(x, weight, bias, *, tile_m=None, tile_n=None,
                      out_dtype=jnp.bfloat16):
    """x: (batch, seq, d_model); weight: (d_model, vocab); bias: (vocab,).

    out_dtype=jnp.bfloat16 (default) halves the resident-output VMEM and the HBM
    writeback; pass jnp.float32 for bit-closer parity with the PyTorch module.
    """
    batch, seq, d_model = x.shape
    vocab = weight.shape[1]
    M = batch * seq

    # Pad vocab up to a lane multiple so the weight streams in bounded tiles.
    # Pad columns get bias = -inf so they never contribute to the logsumexp.
    vocab_pad = _round_up(vocab, 128)
    w = weight if weight.dtype == jnp.bfloat16 else weight.astype(jnp.bfloat16)
    b = bias.astype(jnp.float32)
    if vocab_pad != vocab:
        w = jnp.pad(w, ((0, 0), (0, vocab_pad - vocab)))
        b = jnp.pad(b, (0, vocab_pad - vocab), constant_values=-jnp.inf)
    b2d = b.reshape(1, vocab_pad)

    x2d = x.reshape(M, d_model)   # free reshape; bf16 cast happens inside the kernel

    vmem_cap = _vmem_capacity_bytes()
    out_itemsize = jnp.dtype(out_dtype).itemsize
    tm, tn = _derive_tiles(M, d_model, vocab_pad,
                           x_itemsize=x2d.dtype.itemsize,
                           out_itemsize=out_itemsize,
                           tile_m=tile_m, tile_n=tile_n, vmem_cap=vmem_cap)
    grid = (pl.cdiv(M, tm), vocab_pad // tn)

    # Scoped-VMEM budget: actual tiles + headroom, capped below physical capacity.
    # (If still VMEM-tight, pipeline_mode=pl.Buffered(1) on out_specs is the last lever.)
    est = (2 * tm * d_model * x2d.dtype.itemsize        # x tiles
           + 2 * d_model * tn * 2                       # weight tiles (bf16)
           + 2 * 8 * tn * 4                             # bias tiles (sublane-padded)
           + 2 * tm * vocab_pad * out_itemsize          # resident output block
           + 2 * tm * 128 * 4)                          # lse scratches (lane-padded)
    vmem_limit = int(min(int(0.85 * vmem_cap), max(16 * 2 ** 20, int(1.4 * est))))

    out2d = pl.pallas_call(
        _generator_kernel,
        out_shape=jax.ShapeDtypeStruct((M, vocab_pad), out_dtype),
        grid_spec=pltpu.PrefetchScalarGridSpec(
            num_scalar_prefetch=0,
            grid=grid,
            in_specs=[
                pl.BlockSpec((tm, d_model), lambda i, j: (i, 0)),   # x rows (reused over j)
                pl.BlockSpec((d_model, tn), lambda i, j: (0, j)),   # weight vocab tile
                pl.BlockSpec((1, tn), lambda i, j: (0, j)),         # bias vocab tile
            ],
            out_specs=pl.BlockSpec((tm, vocab_pad), lambda i, j: (i, 0)),  # resident over j
            scratch_shapes=[pltpu.VMEM((tm, 1), jnp.float32),
                            pltpu.VMEM((tm, 1), jnp.float32)],
        ),
        compiler_params=pltpu.CompilerParams(
            dimension_semantics=("parallel", "arbitrary"),
            vmem_limit_bytes=vmem_limit,
        ),
    )(x2d, w, b2d)

    if vocab_pad != vocab:
        out2d = out2d[:, :vocab]
    return out2d.reshape(batch, seq, vocab)


def reference_forward(x, weight, bias):
    # Same bf16 matmul operands / f32 accumulation as the kernel, then exact log_softmax.
    logits = jnp.einsum("bsd,dv->bsv",
                        x.astype(jnp.bfloat16), weight.astype(jnp.bfloat16),
                        preferred_element_type=jnp.float32) + bias
    return jax.nn.log_softmax(logits, axis=-1)


if __name__ == "__main__":
    key = jax.random.PRNGKey(0)
    k_x, k_w, k_b = jax.random.split(key, 3)

    batch, seq, d_model, vocab = 2, 9, 32, 256

    # Deterministic init mimicking nn.Linear's U(-1/sqrt(d_model), 1/sqrt(d_model)).
    bound = 1.0 / math.sqrt(d_model)
    weight = jax.random.uniform(k_w, (d_model, vocab), jnp.float32, -bound, bound)
    bias = jax.random.uniform(k_b, (vocab,), jnp.float32, -bound, bound)
    x = jax.random.normal(k_x, (batch, seq, d_model), jnp.float32)

    ref = reference_forward(x, weight, bias)

    # 1) Default config: bf16 stash/writeback, auto-derived tiles, >=2 row tiles
    #    (megacore) with a ragged last row block (M=18, tm=16).
    out_bf16 = jax.block_until_ready(generator_forward(x, weight, bias))

    # 2) f32 output with forced small tiles: exercises the online logsumexp across
    #    vocab tiles and the ragged-M path at full precision.
    out_f32 = jax.block_until_ready(
        generator_forward(x, weight, bias, tile_m=8, tile_n=128,
                          out_dtype=jnp.float32))

    # 3) Non-lane-multiple vocab: exercises vocab padding with -inf bias columns.
    vocab2 = 200
    w2 = weight[:, :vocab2]
    b2 = bias[:vocab2]
    ref2 = reference_forward(x, w2, b2)
    out_pad = jax.block_until_ready(
        generator_forward(x, w2, b2, out_dtype=jnp.float32))

    assert out_bf16.shape == (batch, seq, vocab) and out_bf16.dtype == jnp.bfloat16
    assert out_f32.shape == (batch, seq, vocab)
    assert out_pad.shape == (batch, seq, vocab2)
    assert jnp.allclose(out_f32, ref, atol=1e-4, rtol=1e-4), "f32 tiled-path mismatch"
    assert jnp.allclose(out_pad, ref2, atol=1e-4, rtol=1e-4), "vocab-padding mismatch"
    # bf16 stash + bf16 writeback double-rounds the log-probs (~3 significant digits).
    assert jnp.allclose(out_bf16.astype(jnp.float32), ref, atol=6e-2, rtol=2e-2), \
        "bf16 default-path mismatch"

    print("KERNEL_OK")
</pallas_src>

<mosaic_0001>
module attributes {stable_mosaic.version = 11 : i64} {
  func.func @_generator_kernel(%arg0: i32, %arg1: i32, %arg2: memref<16x32xf32, #tpu.memory_space<vmem>>, %arg3: memref<32x256xbf16, #tpu.memory_space<vmem>>, %arg4: memref<1x256xf32, #tpu.memory_space<vmem>>, %arg5: memref<16x256xbf16, #tpu.memory_space<vmem>>, %arg6: memref<16x1xf32, #tpu.memory_space<vmem>>, %arg7: memref<16x1xf32, #tpu.memory_space<vmem>>) attributes {dimension_semantics = [#tpu.dimension_semantics<parallel>, #tpu.dimension_semantics<arbitrary>], iteration_bounds = array<i64: 2, 1>, scalar_prefetch = 0 : i64, scratch_operands = 2 : i64, tpu.core_type = #tpu.core_type<tc>, window_params = [{transform_indices = @transform_0, window_bounds = array<i64: 16, 32>}, {transform_indices = @transform_1, window_bounds = array<i64: 32, 256>}, {transform_indices = @transform_2, window_bounds = array<i64: 1, 256>}, {transform_indices = @transform_3, window_bounds = array<i64: 16, 256>}]} {
    %c0_i32 = arith.constant 0 : i32
    %0 = arith.cmpi eq, %arg1, %c0_i32 : i32
    %1 = arith.extui %0 : i1 to i32
    %c0_i32_0 = arith.constant 0 : i32
    %2 = arith.cmpi ne, %1, %c0_i32_0 : i32
    scf.if %2 {
      %cst_19 = arith.constant 0xFF800000 : f32
      %34 = vector.broadcast %cst_19 : f32 to vector<16x1xf32>
      %c0_20 = arith.constant 0 : index
      %c0_21 = arith.constant 0 : index
      %35 = vector.load %arg6[%c0_20, %c0_21] : memref<16x1xf32, #tpu.memory_space<vmem>>, vector<16x1xf32>
      tpu.vector_store %arg6[%c0_20, %c0_21], %34 {strides = array<i32>} : memref<16x1xf32, #tpu.memory_space<vmem>>, vector<16x1xf32>,
      %cst_22 = arith.constant 0.000000e+00 : f32
      %36 = vector.broadcast %cst_22 : f32 to vector<16x1xf32>
      %c0_23 = arith.constant 0 : index
      %c0_24 = arith.constant 0 : index
      %37 = vector.load %arg7[%c0_23, %c0_24] : memref<16x1xf32, #tpu.memory_space<vmem>>, vector<16x1xf32>
      tpu.vector_store %arg7[%c0_23, %c0_24], %36 {strides = array<i32>} : memref<16x1xf32, #tpu.memory_space<vmem>>, vector<16x1xf32>,
    } else {
    }
    %c0 = arith.constant 0 : index
    %c0_1 = arith.constant 0 : index
    %3 = vector.load %arg2[%c0, %c0_1] : memref<16x32xf32, #tpu.memory_space<vmem>>, vector<16x32xf32>
    %4 = arith.truncf %3 : vector<16x32xf32> to vector<16x32xbf16>
    %c0_2 = arith.constant 0 : index
    %c0_3 = arith.constant 0 : index
    %5 = vector.load %arg3[%c0_2, %c0_3] : memref<32x256xbf16, #tpu.memory_space<vmem>>, vector<32x256xbf16>
    %cst = arith.constant dense<0.000000e+00> : vector<16x256xf32>
    %6 = tpu.matmul %4, %5, %cst {dimension_numbers = #tpu.dot_dimension_numbers<[1], [0], [0], [1], [0, 0, 1, 1], [], []>} : vector<16x32xbf16>, vector<32x256xbf16>, vector<16x256xf32> -> vector<16x256xf32>
    %c0_4 = arith.constant 0 : index
    %c0_5 = arith.constant 0 : index
    %7 = vector.load %arg4[%c0_4, %c0_5] : memref<1x256xf32, #tpu.memory_space<vmem>>, vector<1x256xf32>
    %8 = vector.broadcast %7 : vector<1x256xf32> to vector<16x256xf32>
    %9 = arith.addf %6, %8 : vector<16x256xf32>
    %c0_6 = arith.constant 0 : index
    %c0_7 = arith.constant 0 : index
    %10 = vector.load %arg6[%c0_6, %c0_7] : memref<16x1xf32, #tpu.memory_space<vmem>>, vector<16x1xf32>
    %cst_8 = arith.constant dense<0xFF800000> : vector<16xf32>
    %11 = vector.multi_reduction <maximumf>, %9, %cst_8 [1] : vector<16x256xf32> to vector<16xf32>
    %12 = vector.shape_cast %11 : vector<16xf32> to vector<16x1xf32>
    %13 = arith.maximumf %10, %12 : vector<16x1xf32>
    %c0_9 = arith.constant 0 : index
    %c0_10 = arith.constant 0 : index
    %14 = vector.load %arg7[%c0_9, %c0_10] : memref<16x1xf32, #tpu.memory_space<vmem>>, vector<16x1xf32>
    %15 = arith.subf %10, %13 : vector<16x1xf32>
    %16 = math.exp %15 : vector<16x1xf32>
    %17 = arith.mulf %14, %16 : vector<16x1xf32>
    %18 = vector.broadcast %13 : vector<16x1xf32> to vector<16x256xf32>
    %19 = arith.subf %9, %18 : vector<16x256xf32>
    %20 = math.exp %19 : vector<16x256xf32>
    %cst_11 = arith.constant dense<0.000000e+00> : vector<16xf32>
    %21 = vector.multi_reduction <add>, %20, %cst_11 [1] : vector<16x256xf32> to vector<16xf32>
    %22 = vector.shape_cast %21 : vector<16xf32> to vector<16x1xf32>
    %23 = arith.addf %17, %22 : vector<16x1xf32>
    %c0_12 = arith.constant 0 : index
    %c0_13 = arith.constant 0 : index
    %24 = vector.load %arg7[%c0_12, %c0_13] : memref<16x1xf32, #tpu.memory_space<vmem>>, vector<16x1xf32>
    tpu.vector_store %arg7[%c0_12, %c0_13], %23 {strides = array<i32>} : memref<16x1xf32, #tpu.memory_space<vmem>>, vector<16x1xf32>,
    %c0_14 = arith.constant 0 : index
    %c0_15 = arith.constant 0 : index
    %25 = vector.load %arg6[%c0_14, %c0_15] : memref<16x1xf32, #tpu.memory_space<vmem>>, vector<16x1xf32>
    tpu.vector_store %arg6[%c0_14, %c0_15], %13 {strides = array<i32>} : memref<16x1xf32, #tpu.memory_space<vmem>>, vector<16x1xf32>,
    %c256_i32 = arith.constant 256 : i32
    %26 = arith.muli %arg1, %c256_i32 : i32
    %27 = tpu.assume_multiple %26, 256 : i32
    %28 = arith.truncf %9 : vector<16x256xf32> to vector<16x256xbf16>
    %c0_16 = arith.constant 0 : index
    %29 = arith.index_cast %27 : i32 to index
    %30 = vector.load %arg5[%c0_16, %29] : memref<16x256xbf16, #tpu.memory_space<vmem>>, vector<16x256xbf16>
    tpu.vector_store %arg5[%c0_16, %29], %28 {strides = array<i32>} : memref<16x256xbf16, #tpu.memory_space<vmem>>, vector<16x256xbf16>,
    %c0_i32_17 = arith.constant 0 : i32
    %31 = arith.cmpi eq, %arg1, %c0_i32_17 : i32
    %32 = arith.extui %31 : i1 to i32
    %c0_i32_18 = arith.constant 0 : i32
    %33 = arith.cmpi ne, %32, %c0_i32_18 : i32
    scf.if %33 {
      %c0_19 = arith.constant 0 : index
      %c0_20 = arith.constant 0 : index
      %34 = vector.load %arg6[%c0_19, %c0_20] : memref<16x1xf32, #tpu.memory_space<vmem>>, vector<16x1xf32>
      %c0_21 = arith.constant 0 : index
      %c0_22 = arith.constant 0 : index
      %35 = vector.load %arg7[%c0_21, %c0_22] : memref<16x1xf32, #tpu.memory_space<vmem>>, vector<16x1xf32>
      %36 = math.log %35 : vector<16x1xf32>
      %37 = arith.addf %34, %36 : vector<16x1xf32>
      %c0_23 = arith.constant 0 : index
      %c0_24 = arith.constant 0 : index
      %38 = vector.load %arg5[%c0_23, %c0_24] : memref<16x256xbf16, #tpu.memory_space<vmem>>, vector<16x256xbf16>
      %39 = arith.extf %38 : vector<16x256xbf16> to vector<16x256xf32>
      %40 = vector.broadcast %37 : vector<16x1xf32> to vector<16x256xf32>
      %41 = arith.subf %39, %40 : vector<16x256xf32>
      %42 = arith.truncf %41 : vector<16x256xf32> to vector<16x256xbf16>
      %c0_25 = arith.constant 0 : index
      %c0_26 = arith.constant 0 : index
      %43 = vector.load %arg5[%c0_25, %c0_26] : memref<16x256xbf16, #tpu.memory_space<vmem>>, vector<16x256xbf16>
      tpu.vector_store %arg5[%c0_25, %c0_26], %42 {strides = array<i32>} : memref<16x256xbf16, #tpu.memory_space<vmem>>, vector<16x256xbf16>,
    } else {
    }
    return
  }
  func.func @transform_0(%arg0: i32, %arg1: i32) -> (i32, i32) {
    %c0_i32 = arith.constant 0 : i32
    %c0_i32_0 = arith.constant 0 : i32
    return %arg0, %c0_i32 : i32, i32
  }
  func.func @transform_1(%arg0: i32, %arg1: i32) -> (i32, i32) {
    %c0_i32 = arith.constant 0 : i32
    %c0_i32_0 = arith.constant 0 : i32
    return %c0_i32, %arg1 : i32, i32
  }
  func.func @transform_2(%arg0: i32, %arg1: i32) -> (i32, i32) {
    %c0_i32 = arith.constant 0 : i32
    %c0_i32_0 = arith.constant 0 : i32
    return %c0_i32, %arg1 : i32, i32
  }
  func.func @transform_3(%arg0: i32, %arg1: i32) -> (i32, i32) {
    %c0_i32 = arith.constant 0 : i32
    %c0_i32_0 = arith.constant 0 : i32
    return %arg0, %c0_i32 : i32, i32
  }
}

</mosaic_0001>

<bundles_post_ra>
// kernel: tpu_custom_call.1
= control target key start
LH: loop header
LB: loop body
LE: loop exit
PB: predicated region body
PF: predicated region fallthrough
CT: control target
= control target key end

     0   :  { %8 = vsyncpa [#allocation5], 0  ;;  %s1189_s0 = inlined_call_operand.hbm [shape: f32[18,32], index: 0, kind: input, shape index: {}]   ;;  %s1190_s1 = inlined_call_operand.hbm [shape: bf16[32,256], index: 1, kind: input, shape index: {}]   ;;  %s1191_s2 = inlined_call_operand.vmem [shape: f32[1,256], index: 2, kind: input, shape index: {}]   ;;  %s1192_s3 = inlined_call_operand.hbm [shape: bf16[18,256], index: 3, kind: output, shape index: {}]  }
   0x1   :  { %10 = vsyncpa [#allocation5 + $0x1], 0 }
   0x2   :  { %11 = vsyncpa [#allocation8], 0 }
   0x3   :  { %12 = vsyncpa [#allocation6], 0 }
   0x4   :  { %14 = vsyncpa [#allocation6 + $0x1], 0  ;;  %s927_s12 = smov 0   ;;  %s929_s13 = smov 0  }
   0x5   :  { %s931_s14 = smov 0   ;;  %s933_s15 = smov 0  }
   0x6   :  { %s935_s16 = smov 0   ;;  %s937_s17 = smov 0  }
   0x7 LB: > { %s607_s18 = sadd.s32 4294967295, %s893_s17   ;;  %s608_s19 = sadd.s32 4294967294, %s893_s17   ;;  %s893_s17 = sphi %s937_s17, %s20_s17   ;;  %s889_s16 = sphi %s935_s16, %s1214_s16   ;;  %s885_s15 = sphi %s933_s15, %s1213_s15   ;;  %s881_s14 = sphi %s931_s14, %s1212_s14   ;;  %s877_s13 = sphi %s929_s13, %s1211_s13   ;;  %s873_s12 = sphi %s927_s12, %s1210_s12  }
   0x8   : > { %s32_s20 = sadd.s32 1, %s889_s16  ;;  %s39_s21 = sadd.s32 1, %s881_s14 }
   0x9   : > { %p34_p0 = scmp.ge.s32.totalorder %s32_s20, 2  ;;  %p46_p1 = scmp.ne.s32.totalorder %s881_s14, %s877_s13 }
   0xa   : > { %p47_p2 = scmp.eq.s32.totalorder %s893_s17, 0  ;;  %p52_p3 = scmp.ne.s32.totalorder %s877_s13, %s873_s12 }
   0xb   : > { %s1216_s20 = smov (%p34_p0, %s32_s20), 0  ;;  %p972_p5 = scmp.eq.s32.totalorder %s607_s18, 0 }
   0xc   : > { %p968_p4 = por %p47_p2, %p46_p1  ;;  %s36_s24 = ssub.s32 %s889_s16, %s1216_s20 }
   0xd   : > { %s1198_s23 = scalar_select %p972_p5, 1, 0 }
   0xe   : > { %s1197_s22 = scalar_select %p968_p4, 1, 0 }
   0xf   : > { %p128_p6 = scmp.eq.s32.totalorder %s607_s18, 1  ;;  %p37_p7 = scmp.eq.s32.totalorder %s36_s24, 0 }
  0x10   : > { %p980_p8 = por %p972_p5, %p52_p3  ;;  %p134_p10 = scmp.eq.s32.totalorder %s608_s19, 1 }
  0x11   : > { %p984_p9 = por %p128_p6, %p46_p1  ;;  %p609_p12 = scmp.ge.s32.totalorder %s893_s17, 1 }
  0x12   : > { %s1199_s25 = scalar_select %p980_p8, 1, 0 }
  0x13   : > { %s1200_s26 = scalar_select %p984_p9, 1, 0 }
  0x14   : > { %s989_s27 = scalar_select %p37_p7, %s881_s14, %s39_s21  }
  0x15   : > { %p991_p11 = por %p134_p10, %p52_p3  ;;  %p141_p13 = scmp.lt.s32.totalorder %s893_s17, 3 }
  0x16   : > { %s895_s30 = smov [#allocation7]   ;;  %s751_s8 = scalar_lea.hbm %s1190_s1, 512 }
  0x17   : > { %s1201_s28 = scalar_select %p991_p11, 1, 0 }
  0x18   : > { %p997_p0 = pnand %p609_p12, %p141_p13  ;;  %s156_s4 = sshll.u32 %s895_s30, 4  ;;  %s157_s4 = int_to_ptr.vmem [resolvable:$true] %s156_s4 }
  0x19   : > { %p752_p3 = scmp.ne.s32.totalorder %s1190_s1, %s751_s8  ;;  %p758_p12 = scmp.lt.u32.totalorder %s751_s8, %s1190_s1 }
  0x1a   : > { %s1202_s29 = scalar_select %p997_p0, 1, 0 }
  0x1b   : > { %p658_p1 = pneg %p997_p0 }
  0x1d   : > { %p1005_p2 = pnand %p658_p1, %p972_p5 }
  0x1f   : > { %p753_p6 = pneg %p1005_p2 }
  0x21   : > { %p754_p7 = pnand %p753_p6, %p752_p3 }
  0x23   : > { %p755_p10 = pneg %p754_p7 }
  0x25   : > { %p760_p13 = pnand %p758_p12, %p755_p10 }
  0x27   : > { %763 = shalt.err (!%p760_p13)
}
  0x28   : > { %s764_s19 = scalar_lea.vmem %s157_s4, 512  ;;  %p772_p5 = scmp.lt.s32.totalorder %s157_s4, %s157_s4 }
  0x29   : > { %p765_p1 = scmp.ne.s32.totalorder %s157_s4, %s764_s19  ;;  %p773_p8 = scmp.lt.s32.totalorder %s764_s19, %s764_s19 }
  0x2b   : > { %p767_p11 = pnand %p765_p1, %p753_p6  ;;  %p774_p0 = por %p773_p8, %p772_p5 }
  0x2d   : > { %p768_p9 = pneg %p767_p11 }
  0x2f   : > { %p775_p4 = pnand %p774_p0, %p768_p9 }
  0x31   : > { %778 = shalt.err (!%p775_p4)
}
  0x32   : > { %s896_s21 = smov 128   ;;  %s897_s24 = smov 8  }
  0x33   : > { %661 = dma.hbm_to_vmem [thread:$0]  (!%p1005_p2), %s1190_s1, 512, %s157_s4, [#allocation8], %s896_s21, %s896_s21, %s897_s24  }
  0x34   : > { %p612_p3 = scmp.ge.s32.totalorder %s893_s17, 2 }
  0x35   : > { %p1204_p11 = scmp.ne.s32.totalorder (!%p612_p3), %s1197_s22, 0 }
  0x36   : > { %174 = sbr.rel (%p612_p3) target bundleno = 96 (0x60), region = 24 }
  0x3d   : > { %177 = sbr.rel (!%p1204_p11) target bundleno = 96 (0x60), region = 28  ;;  %s178_s7 = sand.u32 (%p1204_p11), 1, %s881_s14  }
  0x3e   : > { %s614_s8 = sshll.u32 (%p1204_p11), %s889_s16, 1  ;;  %s613_s9 = sshll.u32 (%p1204_p11), %s178_s7, 4 }
  0x3f   : > { %s184_s10 = ssub.s32 (%p1204_p11), 3, %s614_s8  ;;  %s1035_s11 = scalar_lea.sflag (%p1204_p11), [#allocation5], %s178_s7 }
  0x40   : > { %p185_p4 = scmp.lt.s32.totalorder (%p1204_p11), %s184_s10, 2  ;;  %s182_s18 = scalar_lea.vmem (%p1204_p11), [#allocation4], %s613_s9 }
  0x44   : > { %s1218_s10 = smov (!%p185_p4, %s184_s10), 2 }
  0x45   : > { %s1032_s5 = sshll.u32 %s1218_s10, 7 }
  0x46   : > { %s189_s4 = ssub.s32 256, %s1032_s5 }
  0x47   : > { %190 = vsyncadd %s1035_s11, %s189_s4  ;;  %p616_p5 = scmp.ne.s32.totalorder %s1032_s5, 0  ;;  %s644_s22 = sshll.u32 %s889_s16, 8 }
  0x48   : > { %s1043_s24 = scalar_lea.hbm %s1189_s0, %s644_s22  ;;  %s195_s30 = sshll.u32 %s182_s18, 4  ;;  %s1045_s30 = int_to_ptr.vmem [resolvable:$true] %s195_s30 }
  0x49   : > { %s779_s6 = scalar_lea.hbm %s1043_s24, %s1032_s5  ;;  %s783_s9 = scalar_lea.hbm %s1189_s0, 384 }
  0x4a   : > { %p780_p8 = scmp.ne.s32.totalorder %s1043_s24, %s779_s6  ;;  %p784_p2 = scmp.lt.u32.totalorder %s1043_s24, %s1189_s0 }
  0x4b   : > { %p785_p6 = scmp.lt.u32.totalorder %s783_s9, %s779_s6  ;;  %p787_p10 = scmp.lt.u32.totalorder %s779_s6, %s1043_s24 }
  0x4c   : > { %p781_p9 = pnand %p780_p8, %p616_p5 }
  0x4d   : > { %p786_p7 = por %p785_p6, %p784_p2 }
  0x4e   : > { %p782_p0 = pneg %p781_p9 }
  0x4f   : > { %p788_p12 = por %p787_p10, %p786_p7 }
  0x51   : > { %p789_p13 = pnand %p788_p12, %p782_p0 }
  0x53   : > { %792 = shalt.err (!%p789_p13)
}
  0x54   : > { %s793_s18 = scalar_lea.vmem %s1045_s30, %s1032_s5  ;;  %s898_s22 = smov [#allocation4]  }
  0x55   : > { %p794_p1 = scmp.ne.s32.totalorder %s1045_s30, %s793_s18  ;;  %s797_s19 = sshll.u32 %s898_s22, 4  ;;  %s798_s19 = int_to_ptr.vmem [resolvable:$false] %s797_s19 }
  0x56   : > { %s799_s21 = scalar_lea.vmem %s798_s19, 512  ;;  %p800_p8 = scmp.lt.s32.totalorder %s1045_s30, %s798_s19 }
  0x57   : > { %p795_p11 = pnand %p794_p1, %p616_p5  ;;  %p801_p9 = scmp.lt.s32.totalorder %s799_s21, %s793_s18 }
  0x59   : > { %p796_p4 = pneg %p795_p11  ;;  %p802_p2 = por %p801_p9, %p800_p8 }
  0x5b   : > { %p803_p6 = pnand %p802_p2, %p796_p4 }
  0x5d   : > { %806 = shalt.err (!%p803_p6)
}
  0x5e   : > { %s899_s6 = smov 128   ;;  %s900_s7 = smov 8  }
  0x5f   : > { %201 = dma.hbm_to_vmem [thread:$0]  (%p616_p5), %s1043_s24, %s1032_s5, %s1045_s30, %s1035_s11, %s899_s6, %s899_s6, %s900_s7  }
  0x60 PF: > { %p1205_p0 = scmp.ne.s32.totalorder %s1202_s29, 0 }
  0x61   : > { %s1075_s8 = sand.u32 (!%p1205_p0), 1, %s877_s13   ;;  %p1206_p7 = scmp.ne.s32.totalorder (!%p1205_p0), %s1199_s25, 0 }
  0x62   : > { %207 = sbr.rel (%p1205_p0) target bundleno = 958 (0x3be), region = 32  ;;  %s621_s9 = sshll.u32 (!%p1205_p0), %s1075_s8, 4 }
  0x63   : > { %s210_s10 = scalar_lea.sflag (!%p1205_p0), [#allocation5], %s1075_s8  ;;  %s213_s4 = scalar_lea.vmem (!%p1205_p0), [#allocation4], %s621_s9 }
  0x69   : > { %860 = dma.done.wait (%p1206_p7), %s210_s10, 256  }
  0x6a   : > { %862 = vsyncadd (%p1206_p7), %s210_s10, 4294967040  ;;  %p1207_p5 = scmp.ne.s32.totalorder %s1198_s23, 0 }
  0x6c   : > { %864 = dma.done.wait (%p1207_p5), [#allocation8], 512  }
  0x6d   : > { %866 = vsyncadd (%p1207_p5), [#allocation8], 4294966784  ;;  %v901_v0 = vmov 0   ;;  %v729_v1 = vld [vmem:[#allocation7 + $0x4] ss:$8 sps:$4 sm:$0xff]   ;;  %vm310_vm0 = vcmask 261120   ;;  %v280_v9 = vlaneseq }
  0x6e   : > { %346 = vmatprep.mubr.bf16.mxu0 %v901_v0  ;;  %727 = vset.pattern.permute.xlu1 %v901_v0  ;;  %v731_v2 = vld [vmem:[#allocation7] ss:$8 sps:$4 sm:$0xff]   ;;  %v732_v3 = vld [vmem:[#allocation7 + $0x14] ss:$8 sps:$4 sm:$0xff]   ;;  %v734_v4 = vld [vmem:[#allocation7 + $0x10] ss:$8 sps:$4 sm:$0xff]  }
  0x6f   : > { %728 = vset.pattern.permute.xlu0 %v901_v0  ;;  %314 = vmatprep.subr.bf16.mxu0 %v729_v1  ;;  %v271_v5 = vld [vmem:[%s213_s4] sm:$0xff]  ;;  %v272_v6 = vld [vmem:[%s213_s4 + $0x8] sm:$0xff]  ;;  %vm266_vm1 = vcmask 7168   ;;  %v902_v8 = vmov -inf   ;;  %v281_v10 = vshrl.u32 %v280_v9, 7  ;;  %v903_v26 = vmov 0.0  }
  0x70   : > { %315 = vmatpush1.bf16.msra.mxu0 %v731_v2  ;;  %v273_v7 = vpack.c.bf16 %v272_v6, %v271_v5  ;;  %267 = vst.msk [vmem:[#allocation2] sm:$0xff] %vm266_vm1, %v902_v8  ;;  %268 = vst.msk [vmem:[#allocation2 + $0x8] sm:$0xff] %vm266_vm1, %v902_v8  ;;  %v278_v12 = vld [vmem:[%s1191_s2] sm:$0x3]  ;;  %s243_s29 = scalar_lea.vmem [#allocation9], %s621_s9  ;;  %s479_s5 = scalar_lea.sflag [#allocation6], %s1075_s8 }
  0x71   : > { %316 = vmatprep.subr.bf16.mxu0 %v732_v3  ;;  %v282_v11 = vsub.s32 0, %v281_v10  ;;  %v286_v13 = vsub.s32 1, %v281_v10  ;;  %269 = vst.msk [vmem:[#allocation3] sm:$0xff] %vm266_vm1, %v903_v26  ;;  %270 = vst.msk [vmem:[#allocation3 + $0x8] sm:$0xff] %vm266_vm1, %v903_v26  ;;  %p1208_p10 = scmp.ne.s32.totalorder %s1200_s26, 0 }
  0x72   : > { %s634_s11 = sshll.u32 (%p1208_p10), %s885_s15, 1 }
  0x73   : > { %v283_v14 = vrot.slane %v278_v12, %v282_v11  ;;  %v287_v15 = vrot.slane %v278_v12, %v286_v13  ;;  %s487_s24 = ssub.s32 (%p1208_p10), 3, %s634_s11 }
  0x74   : > { %317 = vmatpush1.bf16.msra.mxu0 %v734_v4  ;;  %p488_p12 = scmp.lt.s32.totalorder (%p1208_p10), %s487_s24, 2 }
  0x77   : > { %628 = vmatmul.mubr.msk.bf16.vlgmr.msra.gmra.mrb[0].mxu0 %vm310_vm0, %v273_v7  ;;  %v357_v27 = vld [vmem:[#allocation2] sm:$0xff]  ;;  %v358_v30 = vld [vmem:[#allocation2 + $0x8] sm:$0xff] }
  0x78   : > { %v367_v54 = vld [vmem:[#allocation3] sm:$0xff]  ;;  %v368_v58 = vld [vmem:[#allocation3 + $0x8] sm:$0xff] }
 0x14a   : > { %v348_v16 = vpop.f32.mrb[0].mxu0 }
 0x14b   : > { %v1094_v17 = vadd.f32 %v348_v16, %v283_v14  ;;  %v350_v18 = vpop.f32.mrb[1].mxu0 }
 0x14c   : > { %v1096_v19 = vadd.f32 %v350_v18, %v287_v15  ;;  %v352_v20 = vpop.f32.mrb[2].mxu0 }
 0x14d   : > { %v354_v21 = vpop.f32.mrb[3].mxu0  ;;  %v1098_v22 = vadd.f32 %v352_v20, %v283_v14 }
 0x14e   : > { %v1100_v23 = vadd.f32 %v354_v21, %v287_v15  ;;  %v359_v24 = vmax.f32 %v1094_v17, %v1096_v19  ;;  %v645_v9 = vpack.c.bf16 %v1096_v19, %v1094_v17 }
 0x150   : > { %360 = vmax.xlane.f32.xlu0 %v359_v24  ;;  %v362_v25 = vmax.f32 %v1098_v22, %v1100_v23  ;;  %v646_v10 = vpack.c.bf16 %v1100_v23, %v1098_v22  ;;  %v446_v11 = vunpack.c.l.bf16 %v645_v9  ;;  %v447_v12 = vunpack.c.h.bf16 %v645_v9 }
 0x152   : > { %v448_v18 = vunpack.c.l.bf16 %v646_v10  ;;  %v449_v20 = vunpack.c.h.bf16 %v646_v10 }
 0x154   : > { %363 = vmax.xlane.f32.xlu0 %v362_v25 }
 0x1dd   : > { %v361_v28 = vpop.xlane.xlu0 %360 }
 0x1de   : > { %v365_v29 = vmax.f32 %v357_v27, %v361_v28 }
 0x1e0   : > { %v369_v31 = vsub.f32 %v357_v27, %v365_v29  ;;  %410 = vst.msk [vmem:[#allocation2] sm:$0xff] %vm266_vm1, %v365_v29  ;;  %379 = vperm.xlu1 %727, %v365_v29  }
 0x1e1   : > { %v364_v32 = vpop.xlane.xlu0 %363 }
 0x1e2   : > { %v366_v33 = vmax.f32 %v358_v30, %v364_v32  ;;  %v371_v51 = vmul.f32 1.442695, %v369_v31 }
 0x1e4   : > { %v370_v34 = vsub.f32 %v358_v30, %v366_v33  ;;  %411 = vst.msk [vmem:[#allocation2 + $0x8] sm:$0xff] %vm266_vm1, %v366_v33  ;;  %384 = vperm.xlu1 %727, %v366_v33  }
 0x1e6   : > { %v373_v52 = vmul.f32 1.442695, %v370_v34 }
 0x1e7   : > { %v434_v3 = vld [vmem:[#allocation2] sm:$0xff] }
 0x1eb   : > { %v435_v7 = vld [vmem:[#allocation2 + $0x8] sm:$0xff] }
 0x25f   : > { %v380_v35 = vpop.permute.xlu1 %379 }
 0x260   : > { %v387_v36 = vsub.f32 %v1094_v17, %v380_v35  ;;  %v388_v37 = vsub.f32 %v1096_v19, %v380_v35 }
 0x262   : > { %v391_v38 = vmul.f32 1.442695, %v387_v36  ;;  %v393_v39 = vmul.f32 1.442695, %v388_v37 }
 0x263   : > { %v385_v40 = vpop.permute.xlu1 %384 }
 0x264   : > { %735 = vpow2.f32 %v391_v38  ;;  %v389_v41 = vsub.f32 %v1098_v22, %v385_v40  ;;  %v390_v42 = vsub.f32 %v1100_v23, %v385_v40 }
 0x265   : > { %737 = vpow2.f32 %v393_v39 }
 0x266   : > { %v395_v43 = vmul.f32 1.442695, %v389_v41  ;;  %v397_v44 = vmul.f32 1.442695, %v390_v42 }
 0x268   : > { %739 = vpow2.f32 %v395_v43 }
 0x269   : > { %741 = vpow2.f32 %v397_v44 }
 0x26a   : > { %743 = vpow2.f32 %v371_v51 }
 0x26b   : > { %745 = vpow2.f32 %v373_v52 }
 0x26e   : > { %v736_v45 = vpop.eup %735 }
 0x26f   : > { %v738_v46 = vpop.eup %737 }
 0x270   : > { %v399_v47 = vadd.f32 %v738_v46, %v736_v45 }
 0x272   : > { %v740_v48 = vpop.eup %739  ;;  %400 = vadd.xlane.f32.xlu0 %v399_v47 }
 0x273   : > { %v742_v49 = vpop.eup %741 }
 0x274   : > { %v402_v50 = vadd.f32 %v742_v49, %v740_v48  ;;  %v744_v53 = vpop.eup %743 }
 0x275   : > { %v375_v55 = vmul.f32 %v744_v53, %v367_v54  ;;  %v746_v56 = vpop.eup %745 }
 0x276   : > { %403 = vadd.xlane.f32.xlu1 %v402_v50  ;;  %v376_v60 = vmul.f32 %v746_v56, %v368_v58 }
 0x2ff   : > { %v401_v57 = vpop.xlane.xlu0 %400 }
 0x300   : > { %v405_v59 = vadd.f32 %v401_v57, %v375_v55 }
 0x302   : > { %408 = vst.msk [vmem:[#allocation3] sm:$0xff] %vm266_vm1, %v405_v59 }
 0x303   : > { %v404_v61 = vpop.xlane.xlu1 %403 }
 0x304   : > { %v406_v62 = vadd.f32 %v404_v61, %v376_v60 }
 0x306   : > { %409 = vst.msk [vmem:[#allocation3 + $0x8] sm:$0xff] %vm266_vm1, %v406_v62 }
 0x309   : > { %v436_v63 = vld [vmem:[#allocation3] sm:$0xff] }
 0x30a   : > { %747 = vlog2.f32 %v436_v63 }
 0x30d   : > { %v437_v0 = vld [vmem:[#allocation3 + $0x8] sm:$0xff] }
 0x30e   : > { %749 = vlog2.f32 %v437_v0 }
 0x314   : > { %v748_v1 = vpop.eup %747 }
 0x315   : > { %v439_v2 = vmul.f32 0.6931472, %v748_v1 }
 0x317   : > { %v442_v4 = vadd.f32 %v439_v2, %v434_v3 }
 0x318   : > { %v750_v5 = vpop.eup %749 }
 0x319   : > { %452 = vperm.xlu0 %728, %v442_v4   ;;  %v441_v6 = vmul.f32 0.6931472, %v750_v5 }
 0x31b   : > { %v443_v8 = vadd.f32 %v441_v6, %v435_v7 }
 0x31d   : > { %457 = vperm.xlu1 %727, %v443_v8  }
 0x398   : > { %v453_v13 = vpop.permute.xlu0 %452 }
 0x399   : > { %v460_v14 = vsub.f32 %v446_v11, %v453_v13  ;;  %v461_v15 = vsub.f32 %v447_v12, %v453_v13 }
 0x39b   : > { %v647_v16 = vpack.c.bf16 %v461_v15, %v460_v14  ;;  %485 = sbr.rel (!%p1208_p10) target bundleno = 958 (0x3be), region = 52 }
 0x39c   : > { %v458_v21 = vpop.permute.xlu1 %457 }
 0x39d   : > { %476 = vst [vmem:[%s243_s29] sm:$0xff] %v647_v16  ;;  %v462_v24 = vsub.f32 %v448_v18, %v458_v21  ;;  %v463_v25 = vsub.f32 %v449_v20, %v458_v21 }
 0x39f   : > { %v648_v26 = vpack.c.bf16 %v463_v25, %v462_v24 }
 0x3a1   : > { %477 = vst [vmem:[%s243_s29 + $0x8] sm:$0xff] %v648_v26 }
 0x3a2   : > { %s1220_s24 = smov (!%p488_p12, %s487_s24), 2 }
 0x3a3   : > { %s1126_s30 = sshll.u32 %s1220_s24, 7 }
 0x3a4   : > { %s493_s18 = ssub.s32 256, %s1126_s30 }
 0x3a5   : > { %494 = vsyncadd %s479_s5, %s493_s18  ;;  %p637_p13 = scmp.ne.s32.totalorder %s1126_s30, 0  ;;  %s651_s22 = sshll.u32 %s885_s15, 8 }
 0x3a6   : > { %s1136_s21 = scalar_lea.hbm %s1192_s3, %s651_s22  ;;  %s500_s6 = sshll.u32 %s243_s29, 4  ;;  %s1138_s6 = int_to_ptr.vmem [resolvable:$true] %s500_s6 }
 0x3a7   : > { %s807_s7 = scalar_lea.vmem %s1138_s6, %s1126_s30  ;;  %s904_s9 = smov [#allocation9]  }
 0x3a8   : > { %p808_p1 = scmp.ne.s32.totalorder %s1138_s6, %s807_s7  ;;  %s811_s10 = sshll.u32 %s904_s9, 4  ;;  %s812_s10 = int_to_ptr.vmem [resolvable:$false] %s811_s10 }
 0x3a9   : > { %s813_s15 = scalar_lea.vmem %s812_s10, 512  ;;  %p814_p8 = scmp.lt.s32.totalorder %s1138_s6, %s812_s10 }
 0x3aa   : > { %p809_p11 = pnand %p808_p1, %p637_p13  ;;  %p815_p9 = scmp.lt.s32.totalorder %s813_s15, %s807_s7 }
 0x3ac   : > { %p810_p4 = pneg %p809_p11  ;;  %p816_p2 = por %p815_p9, %p814_p8 }
 0x3ae   : > { %p817_p6 = pnand %p816_p2, %p810_p4 }
 0x3b0   : > { %820 = shalt.err (!%p817_p6)
}
 0x3b1   : > { %s821_s4 = scalar_lea.hbm %s1136_s21, %s1126_s30  ;;  %s825_s29 = scalar_lea.hbm %s1192_s3, 384 }
 0x3b2   : > { %p822_p0 = scmp.ne.s32.totalorder %s1136_s21, %s821_s4  ;;  %p826_p10 = scmp.lt.u32.totalorder %s1136_s21, %s1192_s3 }
 0x3b3   : > { %p827_p12 = scmp.lt.u32.totalorder %s825_s29, %s821_s4  ;;  %p829_p11 = scmp.lt.u32.totalorder %s821_s4, %s1136_s21 }
 0x3b4   : > { %p823_p7 = pnand %p822_p0, %p637_p13 }
 0x3b5   : > { %p828_p1 = por %p827_p12, %p826_p10 }
 0x3b6   : > { %p824_p5 = pneg %p823_p7 }
 0x3b7   : > { %p830_p4 = por %p829_p11, %p828_p1 }
 0x3b9   : > { %p831_p8 = pnand %p830_p4, %p824_p5 }
 0x3bb   : > { %834 = shalt.err (!%p831_p8)
}
 0x3bc   : > { %s905_s18 = smov 128   ;;  %s906_s22 = smov 8  }
 0x3bd   : > { %506 = dma.vmem_to_hbm [thread:$0]  (%p637_p13), %s1138_s6, %s1126_s30, %s1136_s21, %s479_s5, %s905_s18, %s905_s18, %s906_s22  }
 0x3be PF: > { %s515_s26 = sand.u32 1, %s873_s12   ;;  %p1209_p9 = scmp.ne.s32.totalorder %s1201_s28, 0 }
 0x3bf   : > { %s516_s19 = scalar_lea.sflag [#allocation6], %s515_s26 }
 0x3c0   : > { %p663_p2 = pnand %p612_p3, %p1209_p9 }
 0x3c2   : > { %868 = dma.done.wait (!%p663_p2), %s516_s19, 256  }
 0x3c3   : > { %870 = vsyncadd (!%p663_p2), %s516_s19, 4294967040  ;;  %s20_s17 = sadd.s32 1, %s893_s17   ;;  %s1210_s12 = smov %s877_s13 }
 0x3c4   : > { %p17_p6 = scmp.ge.s32.totalorder %s20_s17, 4   ;;  %s1211_s13 = smov %s881_s14 }
 0x3c5   : > { %s1212_s14 = smov %s989_s27  ;;  %s1213_s15 = smov %s889_s16 }
 0x3c6   : > { %s1214_s16 = smov %s1216_s20  ;;  %19 = sbr.rel (!%p17_p6) target bundleno = 7 (0x7), region = 94 }
 0x3cd   :  { %521 = vsyncpa [#allocation5], 1 }
 0x3ce   :  { %523 = vsyncpa [#allocation5 + $0x1], 1 }
 0x3cf   :  { %524 = vsyncpa [#allocation8], 1 }
 0x3d0   :  { %525 = vsyncpa [#allocation6], 1 }
 0x3d1   :  { %527 = vsyncpa [#allocation6 + $0x1], 1 }

</bundles_post_ra>
